<compile_context>
chip_gen: v6e
topology: v6e:2x2x1
jax: 0.10.0
libtpu: 0.0.40
codegen_flags: <defaults>
</compile_context>

<pallas_src>
import functools

import jax
import jax.numpy as jnp
from jax.experimental import pallas as pl
from jax.experimental.pallas import tpu as pltpu


def _round_up(x, m):
    return ((x + m - 1) // m) * m


def _choose_tiles(Bf, Nf, itemsize_sum):
    """Pick (tile_b, tile_n) targeting ~8 MiB of combined (labels + outputs)
    HBM traffic per grid step.  Double-buffered inputs -> ~16 MiB VMEM, safe
    on v5e/v6e (128 MiB) and v7x (64 MiB)."""
    target_block_bytes = 8 << 20
    rows = Bf if Bf < 8 else 8
    budget_n = target_block_bytes // max(1, rows * itemsize_sum)
    budget_n = min(budget_n, 1 << 20)          # sanity cap on row length
    if Nf <= max(budget_n, 128):
        tile_n = Nf                            # one tile; full-dim block is legal
    else:
        tile_n = max(128, (budget_n // 128) * 128)
    # tb = 8 keeps >= 2 "parallel" batch tiles whenever Bf >= 16, so both
    # v7x TensorCores get work; per-step bytes are controlled by tile_n.
    tile_b = Bf if Bf <= 8 else 8
    return tile_b, tile_n


def _sdr_partials_kernel(lab_ref, pred_ref, ll_ref, oo_ref, ol_ref,
                         *, rem, lab_dtype):
    """Accumulate <l,l>, <o,o>, <o,l> for one (tb, tn) tile into the resident
    (tb, 1) f32 output blocks.  `rem` is the (static) number of valid columns
    in the LAST reduction tile, or None if every tile is full."""
    k = pl.program_id(1)
    nk = pl.num_programs(1)

    @pl.when(k == 0)
    def _init():
        ll_ref[...] = jnp.zeros_like(ll_ref)
        oo_ref[...] = jnp.zeros_like(oo_ref)
        ol_ref[...] = jnp.zeros_like(ol_ref)

    def load():
        lab = lab_ref[...]
        prd = pred_ref[...]
        if prd.dtype != lab_dtype:            # torch: outputs.to(labels.dtype)
            prd = prd.astype(lab_dtype)
        return lab.astype(jnp.float32), prd.astype(jnp.float32)

    def accum(lab, prd):
        ll_ref[...] += jnp.sum(lab * lab, axis=-1, keepdims=True)
        oo_ref[...] += jnp.sum(prd * prd, axis=-1, keepdims=True)
        ol_ref[...] += jnp.sum(prd * lab, axis=-1, keepdims=True)

    if rem is None:
        # No ragged tail anywhere: zero masking work on every step.
        lab, prd = load()
        accum(lab, prd)
    else:
        # Hot path: all but the last reduction tile run unmasked.
        @pl.when(k < nk - 1)
        def _body():
            lab, prd = load()
            accum(lab, prd)

        # Cold path: only the last tile pays for the mask; `rem` is a
        # compile-time constant, so this is a single iota + compare.
        @pl.when(k == nk - 1)
        def _tail():
            lab, prd = load()
            valid = jax.lax.broadcasted_iota(jnp.int32, lab.shape, 1) < rem
            accum(jnp.where(valid, lab, 0.0), jnp.where(valid, prd, 0.0))


@functools.partial(jax.jit, static_argnames=("tile_n", "tile_b"))
def sdr_pallas(outputs, labels, tile_n=None, tile_b=None):
    # PyTorch semantics: truncate to the common length, flatten after batch.
    # (The outputs -> labels.dtype cast happens inside the kernel.)
    length = min(labels.shape[-1], outputs.shape[-1])
    labels2 = labels[..., :length].reshape(labels.shape[0], -1)
    outputs2 = outputs[..., :length].reshape(outputs.shape[0], -1)
    B, N = labels2.shape

    # Small-batch sublane fold: free row-major reshape (B, N) -> (B*f, N/f).
    # Aim for >= 16 rows so blocks are sublane-dense AND there are >= 2
    # parallel batch tiles (both v7x TensorCores used).
    fold = 1
    if B < 16 and N > 0:
        for f in (2, 4, 8, 16):
            if N % f == 0 and B * f <= 64:
                fold = f
                if B * fold >= 16:
                    break
    Bf, Nf = B * fold, N // fold
    labels_f = labels2.reshape(Bf, Nf)
    outputs_f = outputs2.reshape(Bf, Nf)

    lab_isz = labels.dtype.itemsize
    out_isz = outputs.dtype.itemsize
    tb, tn = _choose_tiles(Bf, Nf, lab_isz + out_isz)
    if tile_b is not None:
        tb = tile_b
    if tile_n is not None:
        tn = tile_n

    grid = (pl.cdiv(Bf, tb), pl.cdiv(Nf, tn))
    num_k = grid[1]
    # Static number of valid columns in the last reduction tile (None if the
    # tiles cover Nf exactly -> no masking code emitted at all).
    rem = None
    if (Nf % tn) != 0 or tn > Nf:
        rem = Nf - (num_k - 1) * tn

    kernel = functools.partial(
        _sdr_partials_kernel, rem=rem, lab_dtype=labels.dtype)

    # Double-buffered input blocks + headroom; stays under v7x's 64 MiB.
    block_in_bytes = tb * tn * (lab_isz + out_isz)
    vmem_needed = 2 * block_in_bytes + (4 << 20)
    vmem_limit = int(min(max(vmem_needed, 32 << 20), 48 << 20))

    acc_shape = jax.ShapeDtypeStruct((Bf, 1), jnp.float32)
    ll, oo, ol = pl.pallas_call(
        kernel,
        out_shape=(acc_shape, acc_shape, acc_shape),
        grid_spec=pltpu.PrefetchScalarGridSpec(
            num_scalar_prefetch=0,
            grid=grid,
            in_specs=[
                pl.BlockSpec((tb, tn), lambda j, k: (j, k)),  # labels
                pl.BlockSpec((tb, tn), lambda j, k: (j, k)),  # outputs
            ],
            out_specs=(
                pl.BlockSpec((tb, 1), lambda j, k: (j, 0)),   # <l,l>
                pl.BlockSpec((tb, 1), lambda j, k: (j, 0)),   # <o,o>
                pl.BlockSpec((tb, 1), lambda j, k: (j, 0)),   # <o,l>
            ),
        ),
        compiler_params=pltpu.CompilerParams(
            dimension_semantics=("parallel", "arbitrary"),
            vmem_limit_bytes=vmem_limit,
        ),
        cost_estimate=pl.CostEstimate(
            flops=6 * Bf * Nf,
            transcendentals=0,
            bytes_accessed=Bf * Nf * (lab_isz + out_isz) + 3 * Bf * 4,
        ),
    )(labels_f, outputs_f)

    # Undo the sublane fold and do the tiny O(B) SDR epilogue in plain JAX.
    ll = ll.reshape(B, fold).sum(axis=1)
    oo = oo.reshape(B, fold).sum(axis=1)
    ol = ol.reshape(B, fold).sum(axis=1)

    delta = jnp.float32(1e-7)
    den = ll + oo - 2.0 * ol          # uses pre-delta num, like the torch code
    den = jnp.maximum(den, 0.0) + delta
    num = ll + delta
    sdr = 10.0 * (jnp.log10(num) - jnp.log10(den))
    return sdr.astype(labels.dtype)   # shape (B,), dtype of labels


def _sdr_ref(outputs, labels):
    # Pure-JAX reference mirroring the PyTorch forward.
    if outputs.dtype != labels.dtype:
        outputs = outputs.astype(labels.dtype)
    length = min(labels.shape[-1], outputs.shape[-1])
    labels = labels[..., :length].reshape(labels.shape[0], -1)
    outputs = outputs[..., :length].reshape(outputs.shape[0], -1)
    delta = 1e-7
    lab32 = labels.astype(jnp.float32)
    out32 = outputs.astype(jnp.float32)
    num = jnp.einsum("bi,bi->b", lab32, lab32)
    den = num + jnp.einsum("bi,bi->b", out32, out32) \
        - 2.0 * jnp.einsum("bi,bi->b", out32, lab32)
    den = jnp.log10(jnp.maximum(den, 0.0) + delta)
    numl = jnp.log10(num + delta)
    return (10.0 * (numl - den)).astype(labels.dtype)


if __name__ == "__main__":
    key = jax.random.PRNGKey(0)
    k1, k2, k3, k4, k5, k6, k7, k8 = jax.random.split(key, 8)

    # Case 1: small shapes implied by the module (B=2, C=4, T=16 vs 20) —
    # exercises the length-truncation path and the sublane fold on a tiny N.
    outputs = jax.random.normal(k1, (2, 4, 16), dtype=jnp.float32)
    labels = jax.random.normal(k2, (2, 4, 20), dtype=jnp.float32)
    got = jax.block_until_ready(sdr_pallas(outputs, labels))
    want = _sdr_ref(outputs, labels)
    assert got.shape == (2,)
    assert got.dtype == labels.dtype
    assert jnp.allclose(got, want, atol=1e-4, rtol=1e-4), (got, want)

    # Case 2: mixed dtypes (bf16 outputs, f32 labels) — exercises the
    # in-kernel dtype cast, the fold to 16 rows, and 2 parallel batch tiles.
    outputs2 = jax.random.normal(k3, (2, 4, 5000), dtype=jnp.bfloat16)
    labels2 = jax.random.normal(k4, (2, 4, 5000), dtype=jnp.float32)
    got2 = jax.block_until_ready(sdr_pallas(outputs2, labels2))
    want2 = _sdr_ref(outputs2, labels2)
    assert jnp.allclose(got2, want2, atol=2e-3, rtol=2e-3), (got2, want2)

    # Case 3: forced small N tile — exercises the multi-step reduction and
    # the (cold-path) ragged-tail mask on the last reduction tile, with Bf<8.
    outputs3 = jax.random.normal(k5, (3, 2, 3333), dtype=jnp.float32)
    labels3 = jax.random.normal(k6, (3, 2, 3333), dtype=jnp.float32)
    got3 = jax.block_until_ready(sdr_pallas(outputs3, labels3, tile_n=1024))
    want3 = _sdr_ref(outputs3, labels3)
    assert jnp.allclose(got3, want3, atol=1e-4, rtol=1e-4), (got3, want3)

    # Case 4: ragged batch tiles (Bf=20 with tb=8) — last batch block is
    # partially out-of-bounds; garbage rows are cropped on writeback.
    outputs4 = jax.random.normal(k7, (20, 1, 300), dtype=jnp.float32)
    labels4 = jax.random.normal(k8, (20, 1, 300), dtype=jnp.float32)
    got4 = jax.block_until_ready(sdr_pallas(outputs4, labels4))
    want4 = _sdr_ref(outputs4, labels4)
    assert got4.shape == (20,)
    assert jnp.allclose(got4, want4, atol=1e-4, rtol=1e-4), (got4, want4)

    print("KERNEL_OK")
</pallas_src>

<mosaic_0001>
module attributes {stable_mosaic.version = 11 : i64} {
  func.func @_sdr_partials_kernel(%arg0: i32, %arg1: i32, %arg2: memref<8x8xf32, #tpu.memory_space<vmem>>, %arg3: memref<8x8xf32, #tpu.memory_space<vmem>>, %arg4: memref<8x1xf32, #tpu.memory_space<vmem>>, %arg5: memref<8x1xf32, #tpu.memory_space<vmem>>, %arg6: memref<8x1xf32, #tpu.memory_space<vmem>>) attributes {dimension_semantics = [#tpu.dimension_semantics<parallel>, #tpu.dimension_semantics<arbitrary>], iteration_bounds = array<i64: 2, 1>, scalar_prefetch = 0 : i64, scratch_operands = 0 : i64, tpu.core_type = #tpu.core_type<tc>, window_params = [{transform_indices = @transform_0, window_bounds = array<i64: 8, 8>}, {transform_indices = @transform_1, window_bounds = array<i64: 8, 8>}, {transform_indices = @transform_2, window_bounds = array<i64: 8, 1>}, {transform_indices = @transform_3, window_bounds = array<i64: 8, 1>}, {transform_indices = @transform_4, window_bounds = array<i64: 8, 1>}]} {
    %c0_i32 = arith.constant 0 : i32
    %0 = arith.cmpi eq, %arg1, %c0_i32 : i32
    %1 = arith.extui %0 : i1 to i32
    %c0_i32_0 = arith.constant 0 : i32
    %2 = arith.cmpi ne, %1, %c0_i32_0 : i32
    scf.if %2 {
      %cst_18 = arith.constant 0.000000e+00 : f32
      %23 = vector.broadcast %cst_18 : f32 to vector<8x1xf32>
      %c0_19 = arith.constant 0 : index
      %c0_20 = arith.constant 0 : index
      %24 = vector.load %arg4[%c0_19, %c0_20] : memref<8x1xf32, #tpu.memory_space<vmem>>, vector<8x1xf32>
      tpu.vector_store %arg4[%c0_19, %c0_20], %23 {strides = array<i32>} : memref<8x1xf32, #tpu.memory_space<vmem>>, vector<8x1xf32>,
      %cst_21 = arith.constant 0.000000e+00 : f32
      %25 = vector.broadcast %cst_21 : f32 to vector<8x1xf32>
      %c0_22 = arith.constant 0 : index
      %c0_23 = arith.constant 0 : index
      %26 = vector.load %arg5[%c0_22, %c0_23] : memref<8x1xf32, #tpu.memory_space<vmem>>, vector<8x1xf32>
      tpu.vector_store %arg5[%c0_22, %c0_23], %25 {strides = array<i32>} : memref<8x1xf32, #tpu.memory_space<vmem>>, vector<8x1xf32>,
      %cst_24 = arith.constant 0.000000e+00 : f32
      %27 = vector.broadcast %cst_24 : f32 to vector<8x1xf32>
      %c0_25 = arith.constant 0 : index
      %c0_26 = arith.constant 0 : index
      %28 = vector.load %arg6[%c0_25, %c0_26] : memref<8x1xf32, #tpu.memory_space<vmem>>, vector<8x1xf32>
      tpu.vector_store %arg6[%c0_25, %c0_26], %27 {strides = array<i32>} : memref<8x1xf32, #tpu.memory_space<vmem>>, vector<8x1xf32>,
    } else {
    }
    %c0 = arith.constant 0 : index
    %c0_1 = arith.constant 0 : index
    %3 = vector.load %arg2[%c0, %c0_1] : memref<8x8xf32, #tpu.memory_space<vmem>>, vector<8x8xf32>
    %c0_2 = arith.constant 0 : index
    %c0_3 = arith.constant 0 : index
    %4 = vector.load %arg3[%c0_2, %c0_3] : memref<8x8xf32, #tpu.memory_space<vmem>>, vector<8x8xf32>
    %c0_4 = arith.constant 0 : index
    %c0_5 = arith.constant 0 : index
    %5 = vector.load %arg4[%c0_4, %c0_5] : memref<8x1xf32, #tpu.memory_space<vmem>>, vector<8x1xf32>
    %6 = arith.mulf %3, %3 : vector<8x8xf32>
    %cst = arith.constant dense<0.000000e+00> : vector<8xf32>
    %7 = vector.multi_reduction <add>, %6, %cst [1] : vector<8x8xf32> to vector<8xf32>
    %8 = vector.shape_cast %7 : vector<8xf32> to vector<8x1xf32>
    %9 = arith.addf %5, %8 : vector<8x1xf32>
    %c0_6 = arith.constant 0 : index
    %c0_7 = arith.constant 0 : index
    %10 = vector.load %arg4[%c0_6, %c0_7] : memref<8x1xf32, #tpu.memory_space<vmem>>, vector<8x1xf32>
    tpu.vector_store %arg4[%c0_6, %c0_7], %9 {strides = array<i32>} : memref<8x1xf32, #tpu.memory_space<vmem>>, vector<8x1xf32>,
    %c0_8 = arith.constant 0 : index
    %c0_9 = arith.constant 0 : index
    %11 = vector.load %arg5[%c0_8, %c0_9] : memref<8x1xf32, #tpu.memory_space<vmem>>, vector<8x1xf32>
    %12 = arith.mulf %4, %4 : vector<8x8xf32>
    %cst_10 = arith.constant dense<0.000000e+00> : vector<8xf32>
    %13 = vector.multi_reduction <add>, %12, %cst_10 [1] : vector<8x8xf32> to vector<8xf32>
    %14 = vector.shape_cast %13 : vector<8xf32> to vector<8x1xf32>
    %15 = arith.addf %11, %14 : vector<8x1xf32>
    %c0_11 = arith.constant 0 : index
    %c0_12 = arith.constant 0 : index
    %16 = vector.load %arg5[%c0_11, %c0_12] : memref<8x1xf32, #tpu.memory_space<vmem>>, vector<8x1xf32>
    tpu.vector_store %arg5[%c0_11, %c0_12], %15 {strides = array<i32>} : memref<8x1xf32, #tpu.memory_space<vmem>>, vector<8x1xf32>,
    %c0_13 = arith.constant 0 : index
    %c0_14 = arith.constant 0 : index
    %17 = vector.load %arg6[%c0_13, %c0_14] : memref<8x1xf32, #tpu.memory_space<vmem>>, vector<8x1xf32>
    %18 = arith.mulf %4, %3 : vector<8x8xf32>
    %cst_15 = arith.constant dense<0.000000e+00> : vector<8xf32>
    %19 = vector.multi_reduction <add>, %18, %cst_15 [1] : vector<8x8xf32> to vector<8xf32>
    %20 = vector.shape_cast %19 : vector<8xf32> to vector<8x1xf32>
    %21 = arith.addf %17, %20 : vector<8x1xf32>
    %c0_16 = arith.constant 0 : index
    %c0_17 = arith.constant 0 : index
    %22 = vector.load %arg6[%c0_16, %c0_17] : memref<8x1xf32, #tpu.memory_space<vmem>>, vector<8x1xf32>
    tpu.vector_store %arg6[%c0_16, %c0_17], %21 {strides = array<i32>} : memref<8x1xf32, #tpu.memory_space<vmem>>, vector<8x1xf32>,
    return
  }
  func.func @transform_0(%arg0: i32, %arg1: i32) -> (i32, i32) {
    %c0_i32 = arith.constant 0 : i32
    return %arg0, %arg1 : i32, i32
  }
  func.func @transform_1(%arg0: i32, %arg1: i32) -> (i32, i32) {
    %c0_i32 = arith.constant 0 : i32
    return %arg0, %arg1 : i32, i32
  }
  func.func @transform_2(%arg0: i32, %arg1: i32) -> (i32, i32) {
    %c0_i32 = arith.constant 0 : i32
    %c0_i32_0 = arith.constant 0 : i32
    return %arg0, %c0_i32 : i32, i32
  }
  func.func @transform_3(%arg0: i32, %arg1: i32) -> (i32, i32) {
    %c0_i32 = arith.constant 0 : i32
    %c0_i32_0 = arith.constant 0 : i32
    return %arg0, %c0_i32 : i32, i32
  }
  func.func @transform_4(%arg0: i32, %arg1: i32) -> (i32, i32) {
    %c0_i32 = arith.constant 0 : i32
    %c0_i32_0 = arith.constant 0 : i32
    return %arg0, %c0_i32 : i32, i32
  }
}

</mosaic_0001>

<bundles_post_ra>
// kernel: sdr_pallas.1
= control target key start
LH: loop header
LB: loop body
LE: loop exit
PB: predicated region body
PF: predicated region fallthrough
CT: control target
= control target key end

     0   :  { %s526_s15 = smov 0   ;;  %s528_s16 = smov 0   ;;  %s574_s0 = inlined_call_operand.vmem [shape: f32[16,8], index: 0, kind: input, shape index: {}]   ;;  %s575_s1 = inlined_call_operand.vmem [shape: f32[16,8], index: 1, kind: input, shape index: {}]   ;;  %s576_s2 = inlined_call_operand.vmem [shape: f32[16,1], index: 2, kind: output, shape index: {0}]   ;;  %s577_s3 = inlined_call_operand.vmem [shape: f32[16,1], index: 3, kind: output, shape index: {1}]   ;;  %s578_s4 = inlined_call_operand.vmem [shape: f32[16,1], index: 4, kind: output, shape index: {2}]  }
   0x1   :  { %s530_s17 = smov 0  }
   0x2 LB: > { %s27_s18 = sadd.s32 1, %s494_s16  ;;  %p443_p0 = scmp.ge.s32.totalorder %s498_s17, 1  ;;  %s498_s17 = sphi %s530_s17, %s15_s17   ;;  %s494_s16 = sphi %s528_s16, %s580_s16   ;;  %s490_s15 = sphi %s526_s15, %s579_s15  }
   0x3   : > { %p29_p1 = scmp.ge.s32.totalorder %s27_s18, 2  ;;  %p197_p2 = scmp.lt.s32.totalorder %s498_s17, 3 }
   0x5   : > { %s582_s18 = smov (%p29_p1, %s27_s18), 0  ;;  %p198_p3 = pnand %p443_p0, %p197_p2 }
   0x6   : > { %p239_p4 = scmp.lt.s32.totalorder (!%p198_p3), %s490_s15, 1 }
   0x7   : > { %201 = sbr.rel (%p198_p3) target bundleno = 164 (0xa4), region = 28 }
   0xc   : > { %s584_s15 = smov (!%p239_p4, %s490_s15), 1  ;;  %vm269_vm0 = vcmask 7168   ;;  %vm277_vm1 = vcmask 64512   ;;  %v500_v5 = vmov 0.0  }
   0xd   : > { %s444_s19 = sshll.u32 %s584_s15, 3 }
   0xe   : > { %s245_s22 = scalar_lea.vmem %s574_s0, %s444_s19  ;;  %s252_s25 = scalar_lea.vmem %s575_s1, %s444_s19 }
   0xf   : > { %v273_v0 = vld [vmem:[%s245_s22] sm:$0xff]  ;;  %s256_s28 = scalar_lea.vmem %s576_s2, %s444_s19  ;;  %s264_s5 = scalar_lea.vmem %s578_s4, %s444_s19 }
  0x10   : > { %v274_v1 = vld [vmem:[%s252_s25] sm:$0xff]  ;;  %v276_v2 = vmul.f32 %v273_v0, %v273_v0  ;;  %270 = vst.msk [vmem:[%s256_s28] sm:$0xff] %vm269_vm0, %v500_v5  ;;  %s260_s8 = scalar_lea.vmem %s577_s3, %s444_s19  ;;  %272 = vst.msk [vmem:[%s264_s5] sm:$0xff] %vm269_vm0, %v500_v5 }
  0x11   : > { %v292_v3 = vmul.f32 %v274_v1, %v273_v0  ;;  %v285_v4 = vmul.f32 %v274_v1, %v274_v1  ;;  %271 = vst.msk [vmem:[%s260_s8] sm:$0xff] %vm269_vm0, %v500_v5 }
  0x12   : > { %v278_v6 = vsel %vm277_vm1, %v276_v2, 0.0 }
  0x13   : > { %v293_v7 = vsel %vm277_vm1, %v292_v3, 0.0  ;;  %279 = vadd.xlane.f32.xlu0 %v278_v6  ;;  %v286_v8 = vsel %vm277_vm1, %v285_v4, 0.0 }
  0x14   : > { %294 = vadd.xlane.f32.xlu1 %v293_v7 }
  0x17   : > { %287 = vadd.xlane.f32.xlu0 %v286_v8  ;;  %v275_v9 = vld [vmem:[%s256_s28] sm:$0xff] }
  0x18   : > { %v291_v10 = vld [vmem:[%s264_s5] sm:$0xff] }
  0x19   : > { %v284_v15 = vld [vmem:[%s260_s8] sm:$0xff] }
  0x9c   : > { %v280_v11 = vpop.xlane.xlu0 %279 }
  0x9d   : > { %v295_v12 = vpop.xlane.xlu1 %294  ;;  %v281_v13 = vadd.f32 %v280_v11, %v275_v9 }
  0x9e   : > { %v296_v14 = vadd.f32 %v295_v12, %v291_v10 }
  0x9f   : > { %283 = vst.msk [vmem:[%s256_s28] sm:$0xff] %vm269_vm0, %v281_v13 }
  0xa0   : > { %297 = vst.msk [vmem:[%s264_s5] sm:$0xff] %vm269_vm0, %v296_v14  ;;  %v288_v16 = vpop.xlane.xlu0 %287 }
  0xa1   : > { %v289_v17 = vadd.f32 %v288_v16, %v284_v15 }
  0xa3   : > { %290 = vst.msk [vmem:[%s260_s8] sm:$0xff] %vm269_vm0, %v289_v17 }
  0xa4 PF: > { %s15_s17 = sadd.s32 1, %s498_s17   ;;  %s579_s15 = smov %s494_s16 }
  0xa5   : > { %p12_p5 = scmp.ge.s32.totalorder %s15_s17, 4   ;;  %s580_s16 = smov %s582_s18 }
  0xa7   :  { %14 = sbr.rel (!%p12_p5) target bundleno = 2 (0x2), region = 89 }

</bundles_post_ra>
